<compile_context>
chip_gen: v7x
topology: tpu7x:2x2x1
jax: 0.10.0
libtpu: 0.0.40
codegen_flags: <defaults>
</compile_context>

<pallas_src>
import functools

import jax
import jax.numpy as jnp
from jax.experimental import pallas as pl
from jax.experimental.pallas import tpu as pltpu

LANES = 128
SUBLANES = 8
TILE_ROWS_MAX = 1024   # 1024 x 128 x 4B = 512 KiB per f32 block (~1 MiB double-buffered)
NUM_CHUNKS = 2         # leading "parallel" grid axis (2 TCs on v7x; sequential elsewhere)


def _round_up(x, m):
    return (x + m - 1) // m * m


def _elem_fn(gan_mode, is_real, is_generator):
    """Per-element loss, selected statically (Python-level control flow)."""
    if gan_mode == "vanilla":
        # BCEWithLogitsLoss, numerically stable:
        #   max(x, 0) - x*t + log(1 + exp(-|x|))
        def f(x, t):
            return jnp.maximum(x, 0.0) - x * t + jnp.log1p(jnp.exp(-jnp.abs(x)))
        return f
    if gan_mode == "lsgan":
        def f(x, t):
            d = x - t
            return d * d
        return f
    if gan_mode == "hinge":
        if is_real:
            return lambda x, t: jnp.maximum(1.0 - x, 0.0)
        if is_generator:
            return lambda x, t: -x
        return lambda x, t: jnp.maximum(1.0 + x, 0.0)
    raise NotImplementedError("GAN mode %s is not implemented" % gan_mode)


def _gan_loss_kernel(elem_fn, nt, tile_rows, target_ref, n_ref, x_ref, out_ref):
    # target_ref: SMEM (1,) f32  -- scalar target label
    # n_ref:      SMEM (1,) i32  -- number of valid (unpadded) elements
    # x_ref:      VMEM (tile_rows, 128) -- lane-dense prediction tile (native dtype)
    # out_ref:    VMEM (8, 128) f32     -- per-chunk vreg partial-sum accumulator
    c = pl.program_id(0)   # parallel chunk
    i = pl.program_id(1)   # reduction step within the chunk

    @pl.when(i == 0)
    def _init():
        out_ref[...] = jnp.zeros_like(out_ref)

    tile_elems = tile_rows * LANES
    # NOTE: int32 scalar math -> valid for predictions < 2^31 elements.
    rem = n_ref[0] - (c * nt + i) * tile_elems   # valid elements left in this tile

    x = x_ref[...].astype(jnp.float32)           # per-tile upcast (bf16 stays bf16 over HBM)
    vals = elem_fn(x, target_ref[0])

    def _partial(v):
        # (tile_rows, 128) -> (8, 128): tile-aligned reshape + VPU vector adds only;
        # the single cross-lane reduce happens in the wrapper epilogue.
        return v.reshape(tile_rows // SUBLANES, SUBLANES, LANES).sum(axis=0)

    @pl.when(rem >= tile_elems)                  # fully valid tile: no masking work
    def _full():
        out_ref[...] += _partial(vals)

    @pl.when(jnp.logical_and(rem > 0, rem < tile_elems))   # ragged last tile only
    def _tail():
        local = (
            jax.lax.broadcasted_iota(jnp.int32, (tile_rows, LANES), 0) * LANES
            + jax.lax.broadcasted_iota(jnp.int32, (tile_rows, LANES), 1)
        )
        out_ref[...] += _partial(jnp.where(local < rem, vals, 0.0))
    # rem <= 0: block starts past the end of the data (clamped index_map) -> skip.


def gan_loss(
    prediction,
    gan_mode,
    is_real,
    is_generator=False,
    target_real_label=1.0,
    target_fake_label=0.0,
    target_fake_G_label=1.0,
    tile_rows=TILE_ROWS_MAX,
):
    """Pallas equivalent of GANLoss.forward. Returns a scalar f32 (mean loss)."""
    # Target label selection (matches _get_target_tensor).
    if is_real:
        target = target_real_label
    elif is_generator:
        target = target_fake_G_label
    else:
        target = target_fake_label
    elem_fn = _elem_fn(gan_mode, is_real, is_generator)

    n = prediction.size
    if n == 0:
        raise ValueError("GANLoss of an empty prediction is undefined (mean over 0 elements)")

    # Lane-dense 2D view, kept in the prediction's NATIVE dtype (no f32 HBM copy).
    flat = prediction.reshape(-1)            # metadata-only for contiguous inputs
    lane_pad = (-n) % LANES
    if lane_pad:                             # <= 127 elements; masked out in-kernel
        flat = jnp.pad(flat, (0, lane_pad))
    rows = flat.shape[0] // LANES
    x2d = flat.reshape(rows, LANES)

    tile_rows = min(int(tile_rows), _round_up(rows, SUBLANES))
    tile_rows = _round_up(tile_rows, SUBLANES)
    num_blocks = -(-rows // tile_rows)
    nt = -(-num_blocks // NUM_CHUNKS)        # reduction-axis length per chunk
    max_blk = num_blocks - 1

    def x_index_map(c, i):
        # Clamp so no block starts past the array end; clamped (duplicate) blocks
        # are skipped in the kernel via the `rem <= 0` case.
        return (jnp.minimum(c * nt + i, max_blk), 0)

    target_arr = jnp.full((1,), target, dtype=jnp.float32)
    n_arr = jnp.full((1,), n, dtype=jnp.int32)

    cost = pl.CostEstimate(
        flops=4 * n,
        transcendentals=(2 * n) if gan_mode == "vanilla" else 0,
        bytes_accessed=int(prediction.dtype.itemsize) * n
        + NUM_CHUNKS * SUBLANES * LANES * 4,
    )

    partials = pl.pallas_call(
        functools.partial(_gan_loss_kernel, elem_fn, nt, tile_rows),
        out_shape=jax.ShapeDtypeStruct((NUM_CHUNKS, SUBLANES, LANES), jnp.float32),
        grid_spec=pltpu.PrefetchScalarGridSpec(
            num_scalar_prefetch=0,
            grid=(NUM_CHUNKS, nt),
            in_specs=[
                pl.BlockSpec(memory_space=pltpu.SMEM),        # target label
                pl.BlockSpec(memory_space=pltpu.SMEM),        # valid-element count
                pl.BlockSpec((tile_rows, LANES), x_index_map),
            ],
            out_specs=pl.BlockSpec((None, SUBLANES, LANES), lambda c, i: (c, 0, 0)),
        ),
        compiler_params=pltpu.CompilerParams(
            dimension_semantics=("parallel", "arbitrary"),
        ),
        cost_estimate=cost,
    )(target_arr, n_arr, x2d)

    # Tiny epilogue: one cross-lane reduce over (NUM_CHUNKS, 8, 128) + exact divide by n.
    return jnp.sum(partials) / n


def _ref_gan_loss(prediction, gan_mode, is_real, is_generator=False):
    """Pure-JAX reference for sanity checking (default labels)."""
    x = prediction.astype(jnp.float32)
    if gan_mode in ("vanilla", "lsgan"):
        t = 1.0 if is_real else (1.0 if is_generator else 0.0)
        if gan_mode == "vanilla":
            v = jnp.maximum(x, 0.0) - x * t + jnp.log1p(jnp.exp(-jnp.abs(x)))
        else:
            v = (x - t) ** 2
        return jnp.mean(v)
    if is_real:
        return jnp.mean(jnp.maximum(1.0 - x, 0.0))
    if is_generator:
        return jnp.mean(-x)
    return jnp.mean(jnp.maximum(1.0 + x, 0.0))


if __name__ == "__main__":
    key = jax.random.PRNGKey(0)
    k1, k2, k3 = jax.random.split(key, 3)

    # Typical PatchGAN discriminator logits, NCHW.
    pred_main = jax.random.normal(k1, (2, 4, 16, 16), dtype=jnp.float32)
    # Ragged element count (not a multiple of 128): exercises the masked tail tile.
    pred_ragged = jax.random.normal(k2, (3, 5, 7, 11), dtype=jnp.float32)
    # bf16 logits: DMA'd in native dtype, upcast per-tile inside the kernel.
    pred_bf16 = jax.random.normal(k3, (2, 4, 32, 32), dtype=jnp.float32).astype(jnp.bfloat16)

    cases = [
        ("vanilla", True, False),
        ("vanilla", False, False),
        ("lsgan", False, True),
        ("hinge", True, False),
        ("hinge", False, True),
        ("hinge", False, False),
    ]
    # (prediction, tile_rows): small tile_rows force multi-tile / multi-chunk paths.
    configs = [
        (pred_main, TILE_ROWS_MAX),
        (pred_main, 8),
        (pred_ragged, TILE_ROWS_MAX),
        (pred_bf16, 8),
    ]

    ok = True
    for mode, is_real, is_gen in cases:
        for pred, tr in configs:
            out = jax.block_until_ready(
                gan_loss(pred, mode, is_real, is_gen, tile_rows=tr)
            )
            ref = _ref_gan_loss(pred, mode, is_real, is_gen)
            if not jnp.allclose(out, ref, atol=2e-5, rtol=2e-5):
                ok = False
                print("MISMATCH", mode, is_real, is_gen, tuple(pred.shape), tr,
                      float(out), float(ref))

    if ok:
        print("KERNEL_OK")
</pallas_src>

<mosaic_0001>
module attributes {stable_mosaic.version = 11 : i64} {
  func.func @_gan_loss_kernel(%arg0: i32, %arg1: i32, %arg2: memref<1xf32, #tpu.memory_space<smem>>, %arg3: memref<1xi32, #tpu.memory_space<smem>>, %arg4: memref<16x128xf32, #tpu.memory_space<vmem>>, %arg5: memref<1x8x128xf32, #tpu.memory_space<vmem>>) attributes {dimension_semantics = [#tpu.dimension_semantics<parallel>, #tpu.dimension_semantics<arbitrary>], iteration_bounds = array<i64: 2, 1>, scalar_prefetch = 0 : i64, scratch_operands = 0 : i64, tpu.core_type = #tpu.core_type<tc>, window_params = [{transform_indices = @transform_0, window_bounds = array<i64: 1>}, {transform_indices = @transform_1, window_bounds = array<i64: 1>}, {transform_indices = @transform_2, window_bounds = array<i64: 16, 128>}, {transform_indices = @transform_3, window_bounds = array<i64: 1, 8, 128>}]} {
    %c0_i32 = arith.constant 0 : i32
    %0 = arith.cmpi eq, %arg1, %c0_i32 : i32
    %1 = arith.extui %0 : i1 to i32
    %c0_i32_0 = arith.constant 0 : i32
    %2 = arith.cmpi ne, %1, %c0_i32_0 : i32
    scf.if %2 {
      %cst_10 = arith.constant 0.000000e+00 : f32
      %29 = vector.broadcast %cst_10 : f32 to vector<8x128xf32>
      %c0_11 = arith.constant 0 : index
      %c0_12 = arith.constant 0 : index
      %c0_13 = arith.constant 0 : index
      %30 = vector.load %arg5[%c0_11, %c0_12, %c0_13] : memref<1x8x128xf32, #tpu.memory_space<vmem>>, vector<1x8x128xf32>
      %31 = vector.shape_cast %30 : vector<1x8x128xf32> to vector<8x128xf32>
      %32 = vector.shape_cast %29 : vector<8x128xf32> to vector<1x8x128xf32>
      tpu.vector_store %arg5[%c0_11, %c0_12, %c0_13], %32 {strides = array<i32>} : memref<1x8x128xf32, #tpu.memory_space<vmem>>, vector<1x8x128xf32>,
    } else {
    }
    %c0 = arith.constant 0 : index
    %3 = memref.load %arg3[%c0] : memref<1xi32, #tpu.memory_space<smem>>
    %c1_i32 = arith.constant 1 : i32
    %4 = arith.muli %arg0, %c1_i32 : i32
    %5 = arith.addi %4, %arg1 : i32
    %c2048_i32 = arith.constant 2048 : i32
    %6 = arith.muli %5, %c2048_i32 : i32
    %7 = arith.subi %3, %6 : i32
    %c0_1 = arith.constant 0 : index
    %c0_2 = arith.constant 0 : index
    %8 = vector.load %arg4[%c0_1, %c0_2] : memref<16x128xf32, #tpu.memory_space<vmem>>, vector<16x128xf32>
    %c0_3 = arith.constant 0 : index
    %9 = memref.load %arg2[%c0_3] : memref<1xf32, #tpu.memory_space<smem>>
    %cst = arith.constant 0.000000e+00 : f32
    %10 = vector.broadcast %cst : f32 to vector<16x128xf32>
    %11 = arith.maximumf %8, %10 : vector<16x128xf32>
    %12 = vector.broadcast %9 : f32 to vector<16x128xf32>
    %13 = arith.mulf %8, %12 : vector<16x128xf32>
    %14 = arith.subf %11, %13 : vector<16x128xf32>
    %15 = math.absf %8 : vector<16x128xf32>
    %cst_4 = arith.constant 0.000000e+00 : f32
    %16 = vector.broadcast %cst_4 : f32 to vector<16x128xf32>
    %17 = arith.subf %16, %15 : vector<16x128xf32>
    %18 = math.exp %17 : vector<16x128xf32>
    %19 = math.log1p %18 : vector<16x128xf32>
    %20 = arith.addf %14, %19 : vector<16x128xf32>
    %c2048_i32_5 = arith.constant 2048 : i32
    %21 = arith.cmpi sge, %7, %c2048_i32_5 : i32
    %22 = arith.extui %21 : i1 to i32
    %c0_i32_6 = arith.constant 0 : i32
    %23 = arith.cmpi ne, %22, %c0_i32_6 : i32
    scf.if %23 {
      %c0_10 = arith.constant 0 : index
      %c0_11 = arith.constant 0 : index
      %c0_12 = arith.constant 0 : index
      %29 = vector.load %arg5[%c0_10, %c0_11, %c0_12] : memref<1x8x128xf32, #tpu.memory_space<vmem>>, vector<1x8x128xf32>
      %30 = vector.shape_cast %29 : vector<1x8x128xf32> to vector<8x128xf32>
      %31 = vector.shape_cast %20 : vector<16x128xf32> to vector<2x8x128xf32>
      %cst_13 = arith.constant dense<0.000000e+00> : vector<8x128xf32>
      %32 = vector.multi_reduction <add>, %31, %cst_13 [0] : vector<2x8x128xf32> to vector<8x128xf32>
      %33 = arith.addf %30, %32 : vector<8x128xf32>
      %c0_14 = arith.constant 0 : index
      %c0_15 = arith.constant 0 : index
      %c0_16 = arith.constant 0 : index
      %34 = vector.load %arg5[%c0_14, %c0_15, %c0_16] : memref<1x8x128xf32, #tpu.memory_space<vmem>>, vector<1x8x128xf32>
      %35 = vector.shape_cast %34 : vector<1x8x128xf32> to vector<8x128xf32>
      %36 = vector.shape_cast %33 : vector<8x128xf32> to vector<1x8x128xf32>
      tpu.vector_store %arg5[%c0_14, %c0_15, %c0_16], %36 {strides = array<i32>} : memref<1x8x128xf32, #tpu.memory_space<vmem>>, vector<1x8x128xf32>,
    } else {
    }
    %c0_i32_7 = arith.constant 0 : i32
    %24 = arith.cmpi sgt, %7, %c0_i32_7 : i32
    %c2048_i32_8 = arith.constant 2048 : i32
    %25 = arith.cmpi slt, %7, %c2048_i32_8 : i32
    %26 = arith.andi %24, %25 : i1
    %27 = arith.extui %26 : i1 to i32
    %c0_i32_9 = arith.constant 0 : i32
    %28 = arith.cmpi ne, %27, %c0_i32_9 : i32
    scf.if %28 {
      %29 = tpu.iota {dimensions = array<i32: 0>} : vector<16x128xi32>
      %c128_i32 = arith.constant 128 : i32
      %30 = vector.broadcast %c128_i32 : i32 to vector<16x128xi32>
      %31 = arith.muli %29, %30 : vector<16x128xi32>
      %32 = tpu.iota {dimensions = array<i32: 1>} : vector<16x128xi32>
      %33 = arith.addi %31, %32 : vector<16x128xi32>
      %c0_10 = arith.constant 0 : index
      %c0_11 = arith.constant 0 : index
      %c0_12 = arith.constant 0 : index
      %34 = vector.load %arg5[%c0_10, %c0_11, %c0_12] : memref<1x8x128xf32, #tpu.memory_space<vmem>>, vector<1x8x128xf32>
      %35 = vector.shape_cast %34 : vector<1x8x128xf32> to vector<8x128xf32>
      %36 = vector.broadcast %7 : i32 to vector<16x128xi32>
      %37 = arith.cmpi slt, %33, %36 : vector<16x128xi32>
      %cst_13 = arith.constant 0.000000e+00 : f32
      %38 = vector.broadcast %cst_13 : f32 to vector<16x128xf32>
      %39 = arith.select %37, %20, %38 : vector<16x128xi1>, vector<16x128xf32>
      %40 = vector.shape_cast %39 : vector<16x128xf32> to vector<2x8x128xf32>
      %cst_14 = arith.constant dense<0.000000e+00> : vector<8x128xf32>
      %41 = vector.multi_reduction <add>, %40, %cst_14 [0] : vector<2x8x128xf32> to vector<8x128xf32>
      %42 = arith.addf %35, %41 : vector<8x128xf32>
      %c0_15 = arith.constant 0 : index
      %c0_16 = arith.constant 0 : index
      %c0_17 = arith.constant 0 : index
      %43 = vector.load %arg5[%c0_15, %c0_16, %c0_17] : memref<1x8x128xf32, #tpu.memory_space<vmem>>, vector<1x8x128xf32>
      %44 = vector.shape_cast %43 : vector<1x8x128xf32> to vector<8x128xf32>
      %45 = vector.shape_cast %42 : vector<8x128xf32> to vector<1x8x128xf32>
      tpu.vector_store %arg5[%c0_15, %c0_16, %c0_17], %45 {strides = array<i32>} : memref<1x8x128xf32, #tpu.memory_space<vmem>>, vector<1x8x128xf32>,
    } else {
    }
    return
  }
  func.func @transform_0(%arg0: i32, %arg1: i32) -> i32 {
    %c0_i32 = arith.constant 0 : i32
    %c0_i32_0 = arith.constant 0 : i32
    return %c0_i32 : i32
  }
  func.func @transform_1(%arg0: i32, %arg1: i32) -> i32 {
    %c0_i32 = arith.constant 0 : i32
    %c0_i32_0 = arith.constant 0 : i32
    return %c0_i32 : i32
  }
  func.func @transform_2(%arg0: i32, %arg1: i32) -> (i32, i32) {
    %c1_i32 = arith.constant 1 : i32
    %0 = arith.muli %arg0, %c1_i32 : i32
    %1 = arith.addi %0, %arg1 : i32
    %c0_i32 = arith.constant 0 : i32
    %2 = arith.minsi %1, %c0_i32 : i32
    %c0_i32_0 = arith.constant 0 : i32
    %c0_i32_1 = arith.constant 0 : i32
    return %2, %c0_i32_0 : i32, i32
  }
  func.func @transform_3(%arg0: i32, %arg1: i32) -> (i32, i32, i32) {
    %c0_i32 = arith.constant 0 : i32
    %c0_i32_0 = arith.constant 0 : i32
    %c0_i32_1 = arith.constant 0 : i32
    return %arg0, %c0_i32, %c0_i32_0 : i32, i32, i32
  }
}

</mosaic_0001>

<bundles_post_ra>
// kernel: tpu_custom_call.1
= control target key start
LH: loop header
LB: loop body
LE: loop exit
PB: predicated region body
PF: predicated region fallthrough
CT: control target
= control target key end

     0   :  { %s840_s0 = inlined_call_operand.<no memory space> [shape: f32[1], index: 0, kind: input, shape index: {}]   ;;  %s841_s1 = inlined_call_operand.<no memory space> [shape: s32[1], index: 1, kind: input, shape index: {}]   ;;  %s842_s2 = inlined_call_operand.hbm [shape: f32[16,128], index: 2, kind: input, shape index: {}]   ;;  %s843_s3 = inlined_call_operand.hbm [shape: f32[2,8,128], index: 3, kind: output, shape index: {}]  }
   0x1   :  { %8 = sst [smem:[#allocation2]] %s840_s0 }
   0x2   :  { %9 = sst [smem:[#allocation3]] %s841_s1 }
   0x3   :  { %10 = vsyncpa [#allocation5], 0 }
   0x4   :  { %12 = vsyncpa [#allocation5 + $0x1], 0 }
   0x5   :  { %13 = vsyncpa [#allocation6], 0 }
   0x6   :  { %15 = vsyncpa [#allocation6 + $0x1], 0  ;;  %s667_s16 = smov 0   ;;  %s669_s17 = smov 0  }
   0x7   :  { %s671_s18 = smov 0   ;;  %s673_s19 = smov 0  }
   0x8   :  { %s675_s20 = smov 0   ;;  %s677_s21 = smov 0  }
   0x9   :  { %s679_s0 = smov 0   ;;  %s681_s22 = smov 0  }
   0xa LB: > { %s387_s1 = sadd.s32 4294967295, %s634_s22   ;;  %s388_s23 = sadd.s32 4294967294, %s634_s22   ;;  %s634_s22 = sphi %s681_s22, %s21_s22   ;;  %s630_s0 = sphi %s679_s0, %s862_s0   ;;  %s626_s21 = sphi %s677_s21, %s861_s21   ;;  %s622_s20 = sphi %s675_s20, %s830_s20   ;;  %s618_s19 = sphi %s673_s19, %s860_s19   ;;  %s614_s18 = sphi %s671_s18, %s859_s18   ;;  %s610_s17 = sphi %s669_s17, %s858_s17   ;;  %s606_s16 = sphi %s667_s16, %s857_s16  }
   0xb   : > { %s33_s24 = sadd.s32 1, %s630_s0  ;;  %p603_p1 = scmp.ne.s32.totalorder %s622_s20, 0 }
   0xc   : > { %p35_p0 = scmp.ge.s32.totalorder %s33_s24, 2  ;;  %p96_p2 = scmp.eq.s32.totalorder %s634_s22, 0 }
   0xd   : > { %p101_p3 = scmp.ne.s32.totalorder %s622_s20, %s618_s19  ;;  %p102_p5 = scmp.eq.s32.totalorder %s387_s1, 0 }
   0xe   : > { %s864_s24 = smov (%p35_p0, %s33_s24), 0  ;;  %p713_p4 = por %p603_p1, %p96_p2 }
   0xf   : > { %p717_p6 = por %p102_p5, %p101_p3  ;;  %s111_s27 = ssub.s32 %s630_s0, %s864_s24 }
  0x10   : > { %p112_p7 = scmp.eq.s32.totalorder %s111_s27, 0  ;;  %s114_s28 = sadd.s32 1, %s614_s18 }
  0x11   : > { %s848_s26 = scalar_select %p717_p6, 1, 0 }
  0x12   : > { %s725_s29 = scalar_select %p112_p7, %s614_s18, %s114_s28  }
  0x13   : > { %p124_p8 = scmp.ne.s32.totalorder %s614_s18, %s610_s17  ;;  %p125_p9 = scmp.eq.s32.totalorder %s387_s1, 1 }
  0x14   : > { %p130_p10 = scmp.ne.s32.totalorder %s610_s17, %s606_s16  ;;  %p131_p11 = scmp.eq.s32.totalorder %s388_s23, 1 }
  0x15   : > { %p731_p12 = por %p125_p9, %p124_p8  ;;  %p416_p1 = scmp.lt.s32.totalorder %s634_s22, 2 }
  0x16   : > { %p736_p0 = por %p131_p11, %p130_p10  ;;  %s636_s5 = smov [#allocation4]  }
  0x17   : > { %s849_s30 = scalar_select %p731_p12, 1, 0 }
  0x18   : > { %s850_s4 = scalar_select %p736_p0, 1, 0 }
  0x19   : > { %s171_s6 = sshll.u32 %s636_s5, 4  ;;  %p743_p2 = pnand %p416_p1, %p713_p4  ;;  %s172_s6 = int_to_ptr.vmem [resolvable:$true] %s171_s6 }
  0x1a   : > { %s501_s10 = scalar_lea.hbm %s842_s2, 256 }
  0x1b   : > { %s851_s7 = scalar_select %p743_p2, 1, 0 }
  0x1c   : > { %p502_p3 = scmp.ne.s32.totalorder %s842_s2, %s501_s10  ;;  %p503_p5 = pneg %p743_p2 }
  0x1d   : > { %p508_p9 = scmp.lt.u32.totalorder %s501_s10, %s501_s10  ;;  %p510_p4 = scmp.lt.u32.totalorder %s501_s10, %s842_s2 }
  0x1e   : > { %p504_p7 = pnand %p503_p5, %p502_p3 }
  0x1f   : > { %p511_p10 = por %p510_p4, %p508_p9 }
  0x20   : > { %p505_p8 = pneg %p504_p7 }
  0x22   : > { %p512_p11 = pnand %p511_p10, %p505_p8 }
  0x24   : > { %515 = shalt.err (!%p512_p11)
}
  0x25   : > { %s516_s15 = scalar_lea.vmem %s172_s6, 256  ;;  %s523_s19 = scalar_lea.vmem %s172_s6, 512 }
  0x26   : > { %p517_p1 = scmp.ne.s32.totalorder %s172_s6, %s516_s15  ;;  %p524_p12 = scmp.lt.s32.totalorder %s172_s6, %s172_s6 }
  0x27   : > { %p525_p6 = scmp.lt.s32.totalorder %s523_s19, %s516_s15 }
  0x28   : > { %p519_p13 = pnand %p517_p1, %p503_p5 }
  0x29   : > { %p526_p2 = por %p525_p6, %p524_p12 }
  0x2a   : > { %p520_p0 = pneg %p519_p13 }
  0x2c   : > { %p527_p3 = pnand %p526_p2, %p520_p0 }
  0x2e   : > { %530 = shalt.err (!%p527_p3)
}
  0x2f   : > { %s637_s1 = smov 128   ;;  %s638_s23 = smov 8  }
  0x30   : > { %p852_p7 = scmp.ne.s32.totalorder %s851_s7, 0  ;;  %p394_p8 = scmp.ge.s32.totalorder %s634_s22, 1 }
  0x31   : > { %p179_p9 = scmp.lt.s32.totalorder %s634_s22, 3 }
  0x32   : > { %411 = dma.hbm_to_vmem [thread:$0]  (!%p852_p7), %s842_s2, 256, %s172_s6, [#allocation5], %s637_s1, %s637_s1, %s638_s23  }
  0x33   : > { %p180_p5 = pnand %p394_p8, %p179_p9 }
  0x34   : > { %s185_s28 = sand.u32 (!%p180_p5), 1, %s622_s20   ;;  %p853_p6 = scmp.ne.s32.totalorder (!%p180_p5), %s848_s26, 0 }
  0x35   : > { %183 = sbr.rel (%p180_p5) target bundleno = 148 (0x94), region = 32  ;;  %s395_s5 = sshll.u32 (!%p180_p5), %s185_s28, 4 }
  0x36   : > { %s186_s8 = scalar_lea.sflag (!%p180_p5), [#allocation5], %s185_s28  ;;  %s189_s9 = scalar_lea.vmem (!%p180_p5), [#allocation4], %s395_s5 }
  0x3c   : > { %596 = dma.done.wait (%p853_p6), %s186_s8, 256  }
  0x3d   : > { %598 = vsyncadd (%p853_p6), %s186_s8, 4294967040  ;;  %s209_s7 = sand.u32 1, %s610_s17   ;;  %s221_s6 = sld [smem:[#allocation3]]  ;;  %v639_v0 = vmov 0.0   ;;  %v225_v1 = vld [vmem:[%s189_s9] sm:$0xff]  ;;  %v226_v2 = vld [vmem:[%s189_s9 + $0x8] sm:$0xff] }
  0x3e   : > { %s396_s10 = sshll.u32 %s209_s7, 3  ;;  %s397_s11 = sshll.u32 %s626_s21, 11  ;;  %v235_v3 = vand.u32 2147483647, %v225_v1  ;;  %v236_v4 = vand.u32 2147483647, %v226_v2 }
  0x3f   : > { %s774_s12 = scalar_lea.vmem [#allocation7], %s396_s10  ;;  %s227_s26 = sld [smem:[#allocation2]]  ;;  %v228_v17 = vmax.f32 %v225_v1, 0.0  ;;  %v229_v21 = vmax.f32 %v226_v2, 0.0 }
  0x40   : > { %220 = vst [vmem:[%s774_s12] sm:$0xff] %v639_v0  ;;  %v237_v5 = vsub.f32 0.0, %v235_v3  ;;  %v238_v6 = vsub.f32 0.0, %v236_v4 }
  0x42   : > { %v239_v7 = vmul.f32 1.442695, %v237_v5  ;;  %v241_v8 = vmul.f32 1.442695, %v238_v6 }
  0x43   : > { %s777_s13 = ssub.s32 %s221_s6, %s397_s11 }
  0x44   : > { %493 = vpow2.f32 %v239_v7  ;;  %p398_p12 = scmp.lt.s32.totalorder %s777_s13, 2048 }
  0x45   : > { %495 = vpow2.f32 %v241_v8  ;;  %v230_v15 = vstv %s227_s26 }
  0x46   : > { %v231_v18 = vmul.f32 %v230_v15, %v225_v1  ;;  %v232_v22 = vmul.f32 %v230_v15, %v226_v2 }
  0x47   : > { %v267_v36 = vld [vmem:[%s774_s12] sm:$0xff] (!%p398_p12) }
  0x48   : > { %v233_v26 = vsub.f32 %v228_v17, %v231_v18  ;;  %v234_v29 = vsub.f32 %v229_v21, %v232_v22 }
  0x4e   : > { %v494_v9 = vpop.eup %493 }
  0x4f   : > { %v496_v10 = vpop.eup %495  ;;  %v243_v11 = vadd.f32 1.0, %v494_v9  ;;  %v246_v13 = vmul.f32 -0.5, %v494_v9  ;;  %v249_v19 = vand.u32 2147483647, %v494_v9 }
  0x50   : > { %v252_v12 = vadd.f32 1.0, %v496_v10  ;;  %v255_v14 = vmul.f32 -0.5, %v496_v10  ;;  %v258_v23 = vand.u32 2147483647, %v496_v10 }
  0x51   : > { %497 = vlog2.f32 %v243_v11  ;;  %v247_v16 = vadd.f32 1.0, %v246_v13  ;;  %vm250_vm0 = vcmp.lt.f32.partialorder %v249_v19, 0.0004427343 }
  0x52   : > { %499 = vlog2.f32 %v252_v12  ;;  %v256_v20 = vadd.f32 1.0, %v255_v14  ;;  %vm259_vm1 = vcmp.lt.f32.partialorder %v258_v23, 0.0004427343 }
  0x53   : > { %v248_v24 = vmul.f32 %v494_v9, %v247_v16 }
  0x54   : > { %v257_v27 = vmul.f32 %v496_v10, %v256_v20 }
  0x5a   : > { %266 = sbr.rel (%p398_p12) target bundleno = 103 (0x67), region = 44 }
  0x5b   : > { %v498_v25 = vpop.eup %497 }
  0x5c   : > { %v500_v28 = vpop.eup %499  ;;  %v245_v30 = vmul.f32 0.6931472, %v498_v25 }
  0x5d   : > { %v254_v31 = vmul.f32 0.6931472, %v500_v28 }
  0x5e   : > { %v251_v32 = vsel %vm250_vm0, %v248_v24, %v245_v30 }
  0x5f   : > { %v260_v33 = vsel %vm259_vm1, %v257_v27, %v254_v31  ;;  %v261_v34 = vadd.f32 %v251_v32, %v233_v26 }
  0x60   : > { %v262_v35 = vadd.f32 %v260_v33, %v234_v29 }
  0x62   : > { %v268_v37 = vadd.f32 %v262_v35, %v261_v34 }
  0x64   : > { %v269_v38 = vadd.f32 %v268_v37, %v267_v36 }
  0x66   : > { %270 = vst [vmem:[%s774_s12] sm:$0xff] %v269_v38 }
  0x67 PF: > { %p271_p13 = scmp.gt.s32.totalorder %s777_s13, 0 }
  0x69   : > { %p273_p0 = pnand %p398_p12, %p271_p13 }
  0x6a   : > { %v277_v39 = vlaneseq (!%p273_p0)  ;;  %v287_v44 = vstv (!%p273_p0), %s777_s13 }
  0x6b   : > { %276 = sbr.rel (%p273_p0) target bundleno = 123 (0x7b), region = 48 }
  0x6c   : > { %v278_v40 = vshrl.u32 (!%p273_p0), %v277_v39, 7  ;;  %v283_v41 = vand.u32 (!%p273_p0), 127, %v277_v39 }
  0x6d   : > { %v286_v49 = vld [vmem:[%s774_s12] sm:$0xff] (!%p273_p0) }
  0x6e   : > { %v279_v42 = vadd.s32 (!%p273_p0), 8, %v278_v40  ;;  %v280_v43 = vmul.u32 (!%p273_p0), 128, %v278_v40 }
  0x70   : > { %v281_v45 = vmul.u32 (!%p273_p0), 128, %v279_v42  ;;  %v284_v46 = vadd.s32 (!%p273_p0), %v283_v41, %v280_v43 }
  0x72   : > { %v285_v47 = vadd.s32 %v283_v41, %v281_v45  ;;  %vm288_vm2 = vcmp.lt.s32.totalorder %v284_v46, %v287_v44 }
  0x73   : > { %v290_v48 = vsel %vm288_vm2, %v261_v34, 0.0 }
  0x74   : > { %vm289_vm3 = vcmp.lt.s32.totalorder %v285_v47, %v287_v44 }
  0x75   : > { %v291_v50 = vsel %vm289_vm3, %v262_v35, 0.0 }
  0x76   : > { %v292_v51 = vadd.f32 %v291_v50, %v290_v48 }
  0x78   : > { %v293_v52 = vadd.f32 %v292_v51, %v286_v49 }
  0x7a   : > { %294 = vst [vmem:[%s774_s12] sm:$0xff] %v293_v52 }
  0x7b PF: > { %s400_s14 = sshll.u32 %s626_s21, 7  ;;  %s309_s23 = sshll.u32 %s774_s12, 4  ;;  %s310_s23 = int_to_ptr.vmem [resolvable:$true] %s309_s23 }
  0x7c   : > { %s790_s1 = scalar_lea.hbm %s843_s3, %s400_s14  ;;  %s296_s25 = scalar_lea.sflag [#allocation6], %s209_s7 }
  0x7d   : > { %s531_s27 = scalar_lea.vmem %s310_s23, 128  ;;  %p854_p4 = scmp.ne.s32.totalorder %s849_s30, 0 }
  0x7e   : > { %p532_p2 = scmp.ne.s32.totalorder %s310_s23, %s531_s27  ;;  %s640_s28 = smov [#allocation7]  }
  0x7f   : > { %s535_s5 = sshll.u32 %s640_s28, 4  ;;  %s536_s5 = int_to_ptr.vmem [resolvable:$false] %s535_s5 }
  0x80   : > { %p533_p10 = pnand %p532_p2, %p854_p4  ;;  %s537_s8 = scalar_lea.vmem %s536_s5, 256 }
  0x81   : > { %p538_p1 = scmp.lt.s32.totalorder %s310_s23, %s536_s5  ;;  %p539_p3 = scmp.lt.s32.totalorder %s537_s8, %s531_s27 }
  0x82   : > { %p534_p11 = pneg %p533_p10 }
  0x83   : > { %p540_p7 = por %p539_p3, %p538_p1 }
  0x85   : > { %p541_p8 = pnand %p540_p7, %p534_p11 }
  0x87   : > { %544 = shalt.err (!%p541_p8)
}
  0x88   : > { %s545_s21 = scalar_lea.hbm %s790_s1, 128  ;;  %s549_s6 = scalar_lea.hbm %s843_s3, 256 }
  0x89   : > { %p546_p9 = scmp.ne.s32.totalorder %s790_s1, %s545_s21  ;;  %p550_p12 = scmp.lt.u32.totalorder %s790_s1, %s843_s3 }
  0x8a   : > { %p551_p13 = scmp.lt.u32.totalorder %s549_s6, %s545_s21  ;;  %p553_p2 = scmp.lt.u32.totalorder %s545_s21, %s790_s1 }
  0x8b   : > { %p547_p5 = pnand %p546_p9, %p854_p4 }
  0x8c   : > { %p552_p0 = por %p551_p13, %p550_p12 }
  0x8d   : > { %p548_p6 = pneg %p547_p5 }
  0x8e   : > { %p554_p10 = por %p553_p2, %p552_p0 }
  0x90   : > { %p555_p11 = pnand %p554_p10, %p548_p6 }
  0x92   : > { %558 = shalt.err (!%p555_p11)
}
  0x93   : > { %406 = dma.vmem_to_hbm [thread:$0]  (%p854_p4), %s310_s23, 128, %s790_s1, %s296_s25  }
  0x94 PF: > { %s321_s12 = sand.u32 1, %s606_s16   ;;  %p855_p1 = scmp.ne.s32.totalorder %s850_s4, 0 }
  0x95   : > { %p856_p3 = scmp.ge.s32.totalorder %s634_s22, 2  ;;  %s322_s13 = scalar_lea.sflag [#allocation6], %s321_s12 }
  0x97   : > { %p413_p7 = pnand %p856_p3, %p855_p1 }
  0x99   : > { %600 = dma.done.wait (!%p413_p7), %s322_s13, 128  }
  0x9a   : > { %602 = vsyncadd (!%p413_p7), %s322_s13, 4294967168  ;;  %s21_s22 = sadd.s32 1, %s634_s22   ;;  %s857_s16 = smov %s610_s17 }
  0x9b   : > { %p18_p8 = scmp.ge.s32.totalorder %s21_s22, 4   ;;  %s858_s17 = smov %s614_s18 }
  0x9c   : > { %s859_s18 = smov %s725_s29  ;;  %s860_s19 = smov %s622_s20 }
  0x9d   : > { %s830_s20 = smov 0   ;;  %s861_s21 = smov %s630_s0 }
  0x9e   : > { %s862_s0 = smov %s864_s24  ;;  %20 = sbr.rel (!%p18_p8) target bundleno = 10 (0xa), region = 89 }
  0xa5   :  { %327 = vsyncpa [#allocation5], 1 }
  0xa6   :  { %329 = vsyncpa [#allocation5 + $0x1], 1 }
  0xa7   :  { %330 = vsyncpa [#allocation6], 1 }
  0xa8   :  { %332 = vsyncpa [#allocation6 + $0x1], 1 }

</bundles_post_ra>
